<compile_context>
chip_gen: v7x
topology: tpu7x:2x2x1
jax: 0.10.0
libtpu: 0.0.40
codegen_flags: <defaults>
</compile_context>

<pallas_src>
import functools

import jax
import jax.numpy as jnp
from jax.experimental import pallas as pl
from jax.experimental.pallas import tpu as pltpu


def _mlp_decoder_kernel(z_ref, w1_ref, b1_ref, w2_ref, b2_ref, w3_ref, b3_ref, o_ref):
    # In-kernel bf16 cast of the activations (kernel is DMA-bound; VPU pack is free).
    z_bf = z_ref[...].astype(jnp.bfloat16)
    # fc1 + ReLU  (bf16 MXU inputs, f32 accumulate, f32 bias/ReLU on the VPU)
    h1 = jnp.dot(z_bf, w1_ref[...], preferred_element_type=jnp.float32)
    h1 = jnp.maximum(h1 + b1_ref[...], 0.0)
    # fc2 + ReLU
    h2 = jnp.dot(h1.astype(w2_ref.dtype), w2_ref[...], preferred_element_type=jnp.float32)
    h2 = jnp.maximum(h2 + b2_ref[...], 0.0)
    # final linear (no activation)
    out = jnp.dot(h2.astype(w3_ref.dtype), w3_ref[...], preferred_element_type=jnp.float32)
    o_ref[...] = (out + b3_ref[...]).astype(o_ref.dtype)


def _round_up(x, m):
    return ((x + m - 1) // m) * m


def _choose_batch_tile(B, tile_b):
    """Pick a batch tile: multiple of 8, <= tile_b, and (for B large enough) at least
    2 grid steps so the megacore split / pipeline overlap engage."""
    if B < 16:
        return B                      # single full-extent block (valid via full-dim rule)
    half = _round_up(pl.cdiv(B, 2), 8)   # ensures num_tiles >= 2
    return max(8, min(tile_b, half))


@functools.partial(jax.jit,
                   static_argnames=("n_point", "point_dim", "tile_b", "out_dtype"))
def mlp_decoder_forward(z, params, n_point, point_dim, tile_b=512,
                        out_dtype=jnp.float32):
    """z: (B, zdim) float32. Returns (B, n_point, point_dim) in out_dtype."""
    w1, b1, w2, b2, w3, b3 = params
    B, zdim = z.shape
    hidden = w1.shape[1]
    out_dim = w3.shape[1]
    assert out_dim == n_point * point_dim

    # bf16 weights for the MXU; biases stay f32 (f32 VPU bias/ReLU).
    w1 = w1.astype(jnp.bfloat16)
    w2 = w2.astype(jnp.bfloat16)
    w3 = w3.astype(jnp.bfloat16)
    b1 = b1.astype(jnp.float32)
    b2 = b2.astype(jnp.float32)
    b3 = b3.astype(jnp.float32)

    tb = _choose_batch_tile(B, tile_b)
    num_tiles = pl.cdiv(B, tb)

    out_bytes = jnp.dtype(out_dtype).itemsize
    n_weight_elems = zdim * hidden + hidden * hidden + hidden * out_dim
    cost = pl.CostEstimate(
        flops=2 * B * n_weight_elems,
        transcendentals=0,
        bytes_accessed=(B * (zdim * 4 + out_dim * out_bytes)   # z in, out writeback
                        + 2 * n_weight_elems                   # bf16 weights
                        + 4 * (2 * hidden + out_dim)),         # f32 biases
    )

    cp_kwargs = dict(dimension_semantics=("parallel",))   # megacore-split batch tiles
    if tb >= 2048:
        # Very large tiles overflow v5e's 16 MiB default scoped VMEM; raise the cap.
        cp_kwargs["vmem_limit_bytes"] = 64 << 20

    out_flat = pl.pallas_call(
        _mlp_decoder_kernel,
        out_shape=jax.ShapeDtypeStruct((B, out_dim), out_dtype),
        grid=(num_tiles,),
        in_specs=[
            pl.BlockSpec((tb, zdim), lambda i: (i, 0)),          # z   (pipelined per tile)
            pl.BlockSpec((zdim, hidden), lambda i: (0, 0)),      # W1  (VMEM-resident)
            pl.BlockSpec((1, hidden), lambda i: (0, 0)),         # b1
            pl.BlockSpec((hidden, hidden), lambda i: (0, 0)),    # W2
            pl.BlockSpec((1, hidden), lambda i: (0, 0)),         # b2
            pl.BlockSpec((hidden, out_dim), lambda i: (0, 0)),   # W3
            pl.BlockSpec((1, out_dim), lambda i: (0, 0)),        # b3
        ],
        out_specs=pl.BlockSpec((tb, out_dim), lambda i: (i, 0)),  # flat, lane-dense (384)
        compiler_params=pltpu.CompilerParams(**cp_kwargs),
        cost_estimate=cost,
    )(z.astype(jnp.float32), w1, b1, w2, b2, w3, b3)

    return out_flat.reshape(B, n_point, point_dim)


def init_params(key, zdim, n_point, point_dim, hidden=256):
    """Deterministic init matching nn.Linear default (uniform +/- 1/sqrt(fan_in)).
    Weights stored as (in_features, out_features); biases as (1, out_features)."""
    out_dim = n_point * point_dim
    ks = jax.random.split(key, 6)

    def lin(kw, kb, fan_in, fan_out):
        bound = 1.0 / jnp.sqrt(fan_in)
        w = jax.random.uniform(kw, (fan_in, fan_out), jnp.float32, -bound, bound)
        b = jax.random.uniform(kb, (1, fan_out), jnp.float32, -bound, bound)
        return w, b

    w1, b1 = lin(ks[0], ks[1], zdim, hidden)
    w2, b2 = lin(ks[2], ks[3], hidden, hidden)
    w3, b3 = lin(ks[4], ks[5], hidden, out_dim)
    return (w1, b1, w2, b2, w3, b3)


def reference_forward_bf16(z, params, n_point, point_dim):
    """Pure-JAX reference mirroring the kernel's bf16-input / f32-accumulate numerics."""
    w1, b1, w2, b2, w3, b3 = params
    bf = jnp.bfloat16
    x = jnp.dot(z.astype(bf), w1.astype(bf), preferred_element_type=jnp.float32) + b1
    x = jnp.maximum(x, 0.0)
    x = jnp.dot(x.astype(bf), w2.astype(bf), preferred_element_type=jnp.float32) + b2
    x = jnp.maximum(x, 0.0)
    out = jnp.dot(x.astype(bf), w3.astype(bf), preferred_element_type=jnp.float32) + b3
    return out.reshape(-1, n_point, point_dim)


def reference_forward_f32(z, params, n_point, point_dim):
    """Full-f32 reference matching the PyTorch module's semantics."""
    w1, b1, w2, b2, w3, b3 = params
    x = jnp.maximum(z @ w1 + b1, 0.0)
    x = jnp.maximum(x @ w2 + b2, 0.0)
    out = x @ w3 + b3
    return out.reshape(-1, n_point, point_dim)


if __name__ == "__main__":
    # Small shapes consistent with the module: zdim=32, 128 points of dim 3, batch=8.
    B, zdim, n_point, point_dim = 8, 32, 128, 3

    key = jax.random.PRNGKey(0)
    k_z, k_z2, k_p = jax.random.split(key, 3)
    z = jax.random.normal(k_z, (B, zdim), dtype=jnp.float32)
    params = init_params(k_p, zdim, n_point, point_dim)

    out = jax.block_until_ready(mlp_decoder_forward(z, params, n_point, point_dim))
    assert out.shape == (B, n_point, point_dim), out.shape
    ref_bf = reference_forward_bf16(z, params, n_point, point_dim)
    ref_f32 = reference_forward_f32(z, params, n_point, point_dim)
    assert jnp.allclose(out, ref_bf, atol=1e-3, rtol=1e-3), "mismatch vs bf16 reference"
    assert jnp.allclose(out, ref_f32, atol=5e-2, rtol=5e-2), "mismatch vs f32 reference"

    # Ragged multi-tile path: B=20 with tile_b=8 -> 3 grid steps, last block partial
    # (4 rows), exercising Pallas' masked edge loads/stores (no pad/slice copies).
    B2 = 20
    z2 = jax.random.normal(k_z2, (B2, zdim), dtype=jnp.float32)
    out2 = jax.block_until_ready(
        mlp_decoder_forward(z2, params, n_point, point_dim, tile_b=8))
    assert out2.shape == (B2, n_point, point_dim)
    ref2 = reference_forward_bf16(z2, params, n_point, point_dim)
    assert jnp.allclose(out2, ref2, atol=1e-3, rtol=1e-3), "mismatch (ragged batch)"

    # Optional bf16 output (halves writeback bytes); loose tolerance for the final cast.
    out_bf = jax.block_until_ready(
        mlp_decoder_forward(z, params, n_point, point_dim, out_dtype=jnp.bfloat16))
    assert jnp.allclose(out_bf.astype(jnp.float32), ref_bf, atol=2e-2, rtol=2e-2), \
        "mismatch (bf16 output)"

    print("KERNEL_OK")
</pallas_src>

<mosaic_0001>
module attributes {stable_mosaic.version = 11 : i64} {
  func.func @_mlp_decoder_kernel(%arg0: i32, %arg1: memref<8x32xf32, #tpu.memory_space<vmem>>, %arg2: memref<32x256xbf16, #tpu.memory_space<vmem>>, %arg3: memref<1x256xf32, #tpu.memory_space<vmem>>, %arg4: memref<256x256xbf16, #tpu.memory_space<vmem>>, %arg5: memref<1x256xf32, #tpu.memory_space<vmem>>, %arg6: memref<256x384xbf16, #tpu.memory_space<vmem>>, %arg7: memref<1x384xf32, #tpu.memory_space<vmem>>, %arg8: memref<8x384xf32, #tpu.memory_space<vmem>>) attributes {dimension_semantics = [#tpu.dimension_semantics<parallel>], iteration_bounds = array<i64: 1>, scalar_prefetch = 0 : i64, scratch_operands = 0 : i64, tpu.core_type = #tpu.core_type<tc>, window_params = [{transform_indices = @transform_0, window_bounds = array<i64: 8, 32>}, {pipeline_mode = #tpu.pipeline_mode<synchronous>, transform_indices = @transform_1, window_bounds = array<i64: 32, 256>}, {pipeline_mode = #tpu.pipeline_mode<synchronous>, transform_indices = @transform_2, window_bounds = array<i64: 1, 256>}, {pipeline_mode = #tpu.pipeline_mode<synchronous>, transform_indices = @transform_3, window_bounds = array<i64: 256, 256>}, {pipeline_mode = #tpu.pipeline_mode<synchronous>, transform_indices = @transform_4, window_bounds = array<i64: 1, 256>}, {pipeline_mode = #tpu.pipeline_mode<synchronous>, transform_indices = @transform_5, window_bounds = array<i64: 256, 384>}, {pipeline_mode = #tpu.pipeline_mode<synchronous>, transform_indices = @transform_6, window_bounds = array<i64: 1, 384>}, {transform_indices = @transform_7, window_bounds = array<i64: 8, 384>}]} {
    %c0 = arith.constant 0 : index
    %c0_0 = arith.constant 0 : index
    %0 = vector.load %arg1[%c0, %c0_0] : memref<8x32xf32, #tpu.memory_space<vmem>>, vector<8x32xf32>
    %1 = arith.truncf %0 : vector<8x32xf32> to vector<8x32xbf16>
    %c0_1 = arith.constant 0 : index
    %c0_2 = arith.constant 0 : index
    %2 = vector.load %arg2[%c0_1, %c0_2] : memref<32x256xbf16, #tpu.memory_space<vmem>>, vector<32x256xbf16>
    %cst = arith.constant dense<0.000000e+00> : vector<8x256xf32>
    %3 = tpu.matmul %1, %2, %cst {dimension_numbers = #tpu.dot_dimension_numbers<[1], [0], [0], [1], [0, 0, 1, 1], [], []>} : vector<8x32xbf16>, vector<32x256xbf16>, vector<8x256xf32> -> vector<8x256xf32>
    %c0_3 = arith.constant 0 : index
    %c0_4 = arith.constant 0 : index
    %4 = vector.load %arg3[%c0_3, %c0_4] : memref<1x256xf32, #tpu.memory_space<vmem>>, vector<1x256xf32>
    %5 = vector.broadcast %4 : vector<1x256xf32> to vector<8x256xf32>
    %6 = arith.addf %3, %5 : vector<8x256xf32>
    %cst_5 = arith.constant 0.000000e+00 : f32
    %7 = vector.broadcast %cst_5 : f32 to vector<8x256xf32>
    %8 = arith.maximumf %6, %7 : vector<8x256xf32>
    %9 = arith.truncf %8 : vector<8x256xf32> to vector<8x256xbf16>
    %c0_6 = arith.constant 0 : index
    %c0_7 = arith.constant 0 : index
    %10 = vector.load %arg4[%c0_6, %c0_7] : memref<256x256xbf16, #tpu.memory_space<vmem>>, vector<256x256xbf16>
    %cst_8 = arith.constant dense<0.000000e+00> : vector<8x256xf32>
    %11 = tpu.matmul %9, %10, %cst_8 {dimension_numbers = #tpu.dot_dimension_numbers<[1], [0], [0], [1], [0, 0, 1, 1], [], []>} : vector<8x256xbf16>, vector<256x256xbf16>, vector<8x256xf32> -> vector<8x256xf32>
    %c0_9 = arith.constant 0 : index
    %c0_10 = arith.constant 0 : index
    %12 = vector.load %arg5[%c0_9, %c0_10] : memref<1x256xf32, #tpu.memory_space<vmem>>, vector<1x256xf32>
    %13 = vector.broadcast %12 : vector<1x256xf32> to vector<8x256xf32>
    %14 = arith.addf %11, %13 : vector<8x256xf32>
    %cst_11 = arith.constant 0.000000e+00 : f32
    %15 = vector.broadcast %cst_11 : f32 to vector<8x256xf32>
    %16 = arith.maximumf %14, %15 : vector<8x256xf32>
    %17 = arith.truncf %16 : vector<8x256xf32> to vector<8x256xbf16>
    %c0_12 = arith.constant 0 : index
    %c0_13 = arith.constant 0 : index
    %18 = vector.load %arg6[%c0_12, %c0_13] : memref<256x384xbf16, #tpu.memory_space<vmem>>, vector<256x384xbf16>
    %cst_14 = arith.constant dense<0.000000e+00> : vector<8x384xf32>
    %19 = tpu.matmul %17, %18, %cst_14 {dimension_numbers = #tpu.dot_dimension_numbers<[1], [0], [0], [1], [0, 0, 1, 1], [], []>} : vector<8x256xbf16>, vector<256x384xbf16>, vector<8x384xf32> -> vector<8x384xf32>
    %c0_15 = arith.constant 0 : index
    %c0_16 = arith.constant 0 : index
    %20 = vector.load %arg7[%c0_15, %c0_16] : memref<1x384xf32, #tpu.memory_space<vmem>>, vector<1x384xf32>
    %21 = vector.broadcast %20 : vector<1x384xf32> to vector<8x384xf32>
    %22 = arith.addf %19, %21 : vector<8x384xf32>
    %c0_17 = arith.constant 0 : index
    %c0_18 = arith.constant 0 : index
    %23 = vector.load %arg8[%c0_17, %c0_18] : memref<8x384xf32, #tpu.memory_space<vmem>>, vector<8x384xf32>
    tpu.vector_store %arg8[%c0_17, %c0_18], %22 {strides = array<i32>} : memref<8x384xf32, #tpu.memory_space<vmem>>, vector<8x384xf32>,
    return
  }
  func.func @transform_0(%arg0: i32) -> (i32, i32) {
    %c0_i32 = arith.constant 0 : i32
    %c0_i32_0 = arith.constant 0 : i32
    return %arg0, %c0_i32 : i32, i32
  }
  func.func @transform_1(%arg0: i32) -> (i32, i32) {
    %c0_i32 = arith.constant 0 : i32
    %c0_i32_0 = arith.constant 0 : i32
    %c0_i32_1 = arith.constant 0 : i32
    return %c0_i32, %c0_i32_0 : i32, i32
  }
  func.func @transform_2(%arg0: i32) -> (i32, i32) {
    %c0_i32 = arith.constant 0 : i32
    %c0_i32_0 = arith.constant 0 : i32
    %c0_i32_1 = arith.constant 0 : i32
    return %c0_i32, %c0_i32_0 : i32, i32
  }
  func.func @transform_3(%arg0: i32) -> (i32, i32) {
    %c0_i32 = arith.constant 0 : i32
    %c0_i32_0 = arith.constant 0 : i32
    %c0_i32_1 = arith.constant 0 : i32
    return %c0_i32, %c0_i32_0 : i32, i32
  }
  func.func @transform_4(%arg0: i32) -> (i32, i32) {
    %c0_i32 = arith.constant 0 : i32
    %c0_i32_0 = arith.constant 0 : i32
    %c0_i32_1 = arith.constant 0 : i32
    return %c0_i32, %c0_i32_0 : i32, i32
  }
  func.func @transform_5(%arg0: i32) -> (i32, i32) {
    %c0_i32 = arith.constant 0 : i32
    %c0_i32_0 = arith.constant 0 : i32
    %c0_i32_1 = arith.constant 0 : i32
    return %c0_i32, %c0_i32_0 : i32, i32
  }
  func.func @transform_6(%arg0: i32) -> (i32, i32) {
    %c0_i32 = arith.constant 0 : i32
    %c0_i32_0 = arith.constant 0 : i32
    %c0_i32_1 = arith.constant 0 : i32
    return %c0_i32, %c0_i32_0 : i32, i32
  }
  func.func @transform_7(%arg0: i32) -> (i32, i32) {
    %c0_i32 = arith.constant 0 : i32
    %c0_i32_0 = arith.constant 0 : i32
    return %arg0, %c0_i32 : i32, i32
  }
}

</mosaic_0001>

<bundles_post_ra>
// kernel: mlp_decoder_forward.1
= control target key start
LH: loop header
LB: loop body
LE: loop exit
PB: predicated region body
PF: predicated region fallthrough
CT: control target
= control target key end

     0   :  { %v1014_v1 = vmov 0   ;;  %vm65_vm0 = vcmask 261120   ;;  %s1343_s1 = inlined_call_operand.vmem [shape: bf16[32,256], index: 1, kind: input, shape index: {}]   ;;  %s1344_s0 = inlined_call_operand.vmem [shape: f32[8,32], index: 0, kind: input, shape index: {}]   ;;  %s1345_s3 = inlined_call_operand.vmem [shape: bf16[256,256], index: 3, kind: input, shape index: {}]   ;;  %s1346_s5 = inlined_call_operand.vmem [shape: bf16[256,384], index: 5, kind: input, shape index: {}]   ;;  %s1347_s2 = inlined_call_operand.vmem [shape: f32[1,256], index: 2, kind: input, shape index: {}]   ;;  %s1348_s4 = inlined_call_operand.vmem [shape: f32[1,256], index: 4, kind: input, shape index: {}]   ;;  %s1349_s6 = inlined_call_operand.vmem [shape: f32[1,384], index: 6, kind: input, shape index: {}]   ;;  %s1350_s7 = inlined_call_operand.vmem [shape: f32[8,384], index: 7, kind: output, shape index: {}]  }
   0x1   :  { %v896_v0 = vld [vmem:[%s1343_s1 + $0x4] ss:$8 sps:$4 sm:$0xff]   ;;  %101 = vmatprep.mubr.bf16.mxu0 %v1014_v1  ;;  %v898_v2 = vld [vmem:[%s1343_s1] ss:$8 sps:$4 sm:$0xff]   ;;  %v899_v3 = vld [vmem:[%s1343_s1 + $0x14] ss:$8 sps:$4 sm:$0xff]  }
   0x2   :  { %69 = vmatprep.subr.bf16.mxu0 %v896_v0  ;;  %v901_v4 = vld [vmem:[%s1343_s1 + $0x10] ss:$8 sps:$4 sm:$0xff]   ;;  %v27_v5 = vld [vmem:[%s1344_s0] sm:$0xff]  ;;  %v905_v8 = vld [vmem:[%s1345_s3 + $0x14] ss:$8 sps:$4 sm:$0xff]  }
   0x3   :  { %70 = vmatpush1.bf16.msra.mxu0 %v898_v2  ;;  %v902_v6 = vld [vmem:[%s1345_s3 + $0x4] ss:$8 sps:$4 sm:$0xff]   ;;  %v904_v7 = vld [vmem:[%s1345_s3] ss:$8 sps:$4 sm:$0xff]   ;;  %v28_v9 = vpack.c.bf16 %v27_v5, %v27_v5  ;;  %v907_v10 = vld [vmem:[%s1345_s3 + $0x10] ss:$8 sps:$4 sm:$0xff]  }
   0x4   :  { %71 = vmatprep.subr.bf16.mxu0 %v899_v3  ;;  %318 = vmatprep.subr.bf16.mxu1 %v902_v6  ;;  %v908_v11 = vld [vmem:[%s1345_s3 + $0x24] ss:$8 sps:$4 sm:$0xff]   ;;  %v910_v12 = vld [vmem:[%s1345_s3 + $0x20] ss:$8 sps:$4 sm:$0xff]   ;;  %v911_v13 = vld [vmem:[%s1345_s3 + $0x34] ss:$8 sps:$4 sm:$0xff]  }
   0x5   :  { %319 = vmatpush1.bf16.msra.mxu1 %v904_v7  ;;  %v913_v14 = vld [vmem:[%s1345_s3 + $0x30] ss:$8 sps:$4 sm:$0xff]   ;;  %v914_v15 = vld [vmem:[%s1345_s3 + $0x44] ss:$8 sps:$4 sm:$0xff]   ;;  %v916_v16 = vld [vmem:[%s1345_s3 + $0x40] ss:$8 sps:$4 sm:$0xff]  }
   0x6   :  { %320 = vmatprep.subr.bf16.mxu1 %v905_v8  ;;  %v917_v17 = vld [vmem:[%s1345_s3 + $0x54] ss:$8 sps:$4 sm:$0xff]   ;;  %v919_v18 = vld [vmem:[%s1345_s3 + $0x50] ss:$8 sps:$4 sm:$0xff]   ;;  %v920_v19 = vld [vmem:[%s1345_s3 + $0x64] ss:$8 sps:$4 sm:$0xff]  }
   0x7   :  { %72 = vmatpush1.bf16.msra.mxu0 %v901_v4  ;;  %v922_v20 = vld [vmem:[%s1345_s3 + $0x60] ss:$8 sps:$4 sm:$0xff]   ;;  %v923_v21 = vld [vmem:[%s1345_s3 + $0x74] ss:$8 sps:$4 sm:$0xff]   ;;  %v925_v22 = vld [vmem:[%s1345_s3 + $0x70] ss:$8 sps:$4 sm:$0xff]   ;;  %v35_v4 = vlaneseq }
   0x8   :  { %v926_v23 = vld [vmem:[%s1345_s3 + $0x84] ss:$8 sps:$4 sm:$0xff]   ;;  %v928_v24 = vld [vmem:[%s1345_s3 + $0x80] ss:$8 sps:$4 sm:$0xff]   ;;  %v929_v25 = vld [vmem:[%s1345_s3 + $0x94] ss:$8 sps:$4 sm:$0xff]  }
   0x9   :  { %321 = vmatpush1.bf16.msra.mxu1 %v907_v10  ;;  %v931_v26 = vld [vmem:[%s1345_s3 + $0x90] ss:$8 sps:$4 sm:$0xff]   ;;  %v932_v27 = vld [vmem:[%s1345_s3 + $0xa4] ss:$8 sps:$4 sm:$0xff]   ;;  %v934_v28 = vld [vmem:[%s1345_s3 + $0xa0] ss:$8 sps:$4 sm:$0xff]  }
   0xa   :  { %792 = vmatmul.mubr.msk.bf16.vlgmr.msra.gmra.mrb[0].mxu0 %vm65_vm0, %v28_v9  ;;  %322 = vmatprep.subr.bf16.mxu1 %v908_v11  ;;  %v935_v29 = vld [vmem:[%s1345_s3 + $0xb4] ss:$8 sps:$4 sm:$0xff]   ;;  %v937_v30 = vld [vmem:[%s1345_s3 + $0xb0] ss:$8 sps:$4 sm:$0xff]   ;;  %v938_v31 = vld [vmem:[%s1345_s3 + $0xc4] ss:$8 sps:$4 sm:$0xff]  }
   0xb   :  { %v940_v32 = vld [vmem:[%s1345_s3 + $0xc0] ss:$8 sps:$4 sm:$0xff]   ;;  %v941_v33 = vld [vmem:[%s1345_s3 + $0xd4] ss:$8 sps:$4 sm:$0xff]   ;;  %v943_v34 = vld [vmem:[%s1345_s3 + $0xd0] ss:$8 sps:$4 sm:$0xff]  }
   0xc   :  { %v944_v35 = vld [vmem:[%s1345_s3 + $0xe4] ss:$8 sps:$4 sm:$0xff]   ;;  %v946_v36 = vld [vmem:[%s1345_s3 + $0xe0] ss:$8 sps:$4 sm:$0xff]   ;;  %v947_v37 = vld [vmem:[%s1345_s3 + $0xf4] ss:$8 sps:$4 sm:$0xff]  }
   0xd   :  { %323 = vmatpush1.bf16.msra.mxu1 %v910_v12  ;;  %v949_v38 = vld [vmem:[%s1345_s3 + $0xf0] ss:$8 sps:$4 sm:$0xff]   ;;  %v950_v39 = vld [vmem:[%s1346_s5] ss:$12 sps:$4 sm:$0xff]   ;;  %v955_v41 = vld [vmem:[%s1346_s5 + $0x1c] ss:$12 sps:$4 sm:$0xff]  }
   0xe   :  { %324 = vmatprep.subr.bf16.mxu1 %v911_v13  ;;  %v952_v40 = vld [vmem:[%s1346_s5 + $0x4] ss:$12 sps:$4 sm:$0xff]   ;;  %v958_v43 = vld [vmem:[%s1346_s5 + $0x34] ss:$12 sps:$4 sm:$0xff]   ;;  %v961_v45 = vld [vmem:[%s1346_s5 + $0x4c] ss:$12 sps:$4 sm:$0xff]  }
   0xf   :  { %700 = vmatprep.subr.bf16.mxu0 %v952_v40  ;;  %v953_v42 = vld [vmem:[%s1346_s5 + $0x18] ss:$12 sps:$4 sm:$0xff]   ;;  %v956_v44 = vld [vmem:[%s1346_s5 + $0x30] ss:$12 sps:$4 sm:$0xff]   ;;  %v959_v46 = vld [vmem:[%s1346_s5 + $0x48] ss:$12 sps:$4 sm:$0xff]  }
  0x10   :  { %701 = vmatpush1.bf16.msra.mxu0 %v950_v39  ;;  %v977_v47 = vld [vmem:[%s1346_s5 + $0xc8] ss:$12 sps:$4 sm:$0xff]   ;;  %v964_v48 = vld [vmem:[%s1346_s5 + $0x64] ss:$12 sps:$4 sm:$0xff]   ;;  %v962_v49 = vld [vmem:[%s1346_s5 + $0x60] ss:$12 sps:$4 sm:$0xff]  }
  0x11   :  { %325 = vmatpush1.bf16.msra.mxu1 %v913_v14  ;;  %702 = vmatprep.subr.bf16.mxu0 %v955_v41  ;;  %v967_v50 = vld [vmem:[%s1346_s5 + $0x7c] ss:$12 sps:$4 sm:$0xff]   ;;  %v965_v51 = vld [vmem:[%s1346_s5 + $0x78] ss:$12 sps:$4 sm:$0xff]   ;;  %v970_v52 = vld [vmem:[%s1346_s5 + $0x94] ss:$12 sps:$4 sm:$0xff]  }
  0x12   :  { %326 = vmatprep.subr.bf16.mxu1 %v914_v15  ;;  %v968_v53 = vld [vmem:[%s1346_s5 + $0x90] ss:$12 sps:$4 sm:$0xff]   ;;  %v973_v54 = vld [vmem:[%s1346_s5 + $0xac] ss:$12 sps:$4 sm:$0xff]   ;;  %v971_v55 = vld [vmem:[%s1346_s5 + $0xa8] ss:$12 sps:$4 sm:$0xff]  }
  0x13   :  { %v976_v56 = vld [vmem:[%s1346_s5 + $0xc4] ss:$12 sps:$4 sm:$0xff]   ;;  %v974_v57 = vld [vmem:[%s1346_s5 + $0xc0] ss:$12 sps:$4 sm:$0xff]   ;;  %v981_v58 = vld [vmem:[%s1346_s5 + $0xdc] ss:$12 sps:$4 sm:$0xff]  }
  0x14   :  { %703 = vmatpush1.bf16.msra.mxu0 %v953_v42  ;;  %v979_v59 = vld [vmem:[%s1346_s5 + $0xd8] ss:$12 sps:$4 sm:$0xff]   ;;  %v986_v60 = vld [vmem:[%s1346_s5 + $0xf4] ss:$12 sps:$4 sm:$0xff]   ;;  %v984_v61 = vld [vmem:[%s1346_s5 + $0xf0] ss:$12 sps:$4 sm:$0xff]  }
  0x15   :  { %327 = vmatpush1.bf16.msra.mxu1 %v916_v16  ;;  %704 = vmatprep.subr.bf16.mxu0 %v958_v43  ;;  %v991_v62 = vld [vmem:[%s1346_s5 + $0x10c] ss:$12 sps:$4 sm:$0xff]   ;;  %v989_v63 = vld [vmem:[%s1346_s5 + $0x108] ss:$12 sps:$4 sm:$0xff]   ;;  %v996_v0 = vld [vmem:[%s1346_s5 + $0x124] ss:$12 sps:$4 sm:$0xff]  }
  0x16   :  { %328 = vmatprep.subr.bf16.mxu1 %v917_v17  ;;  %v994_v1 = vld [vmem:[%s1346_s5 + $0x120] ss:$12 sps:$4 sm:$0xff]   ;;  %v1001_v2 = vld [vmem:[%s1346_s5 + $0x13c] ss:$12 sps:$4 sm:$0xff]   ;;  %v999_v3 = vld [vmem:[%s1346_s5 + $0x138] ss:$12 sps:$4 sm:$0xff]  }
  0x17   :  { %v1253_v5 = vshrl.u32 %v35_v4, 7  ;;  %v33_v7 = vld [vmem:[%s1347_s2] sm:$0x3]  ;;  %v1013_v39 = vld [vmem:[%s1346_s5 + $0xb0] ss:$12 sps:$4 sm:$0xff]  }
  0x18   :  { %705 = vmatpush1.bf16.msra.mxu0 %v956_v44  ;;  %v146_v40 = vld [vmem:[%s1348_s4] sm:$0x3] }
  0x19   :  { %329 = vmatpush1.bf16.msra.mxu1 %v919_v18  ;;  %706 = vmatprep.subr.bf16.mxu0 %v961_v45  ;;  %v1256_v6 = vsub.s32 0, %v1253_v5  ;;  %v1262_v8 = vsub.s32 1, %v1253_v5 }
  0x1a   :  { %330 = vmatprep.subr.bf16.mxu1 %v920_v19 }
  0x1b   :  { %v38_v9 = vrot.slane %v33_v7, %v1256_v6  ;;  %v42_v10 = vrot.slane %v33_v7, %v1262_v8  ;;  %v151_v41 = vrot.slane %v146_v40, %v1256_v6  ;;  %v155_v42 = vrot.slane %v146_v40, %v1262_v8 }
  0x1c   :  { %707 = vmatpush1.bf16.msra.mxu0 %v959_v46 }
  0x1d   :  { %331 = vmatpush1.bf16.msra.mxu1 %v922_v20  ;;  %708 = vmatprep.subr.bf16.mxu0 %v964_v48  ;;  %v978_v20 = vld [vmem:[%s1346_s5 + $0x8] ss:$12 sps:$4 sm:$0xff]  }
  0x1e   :  { %332 = vmatprep.subr.bf16.mxu1 %v923_v21 }
  0x20   :  { %709 = vmatpush1.bf16.msra.mxu0 %v962_v49 }
  0x21   :  { %333 = vmatpush1.bf16.msra.mxu1 %v925_v22  ;;  %710 = vmatprep.subr.bf16.mxu0 %v967_v50  ;;  %v982_v22 = vld [vmem:[%s1346_s5 + $0xe0] ss:$12 sps:$4 sm:$0xff]  }
  0x22   :  { %334 = vmatprep.subr.bf16.mxu1 %v926_v23  ;;  %v983_v23 = vld [vmem:[%s1346_s5 + $0x20] ss:$12 sps:$4 sm:$0xff]  }
  0x24   :  { %711 = vmatpush1.bf16.msra.mxu0 %v965_v51 }
  0x25   :  { %335 = vmatpush1.bf16.msra.mxu1 %v928_v24  ;;  %712 = vmatprep.subr.bf16.mxu0 %v970_v52  ;;  %v987_v24 = vld [vmem:[%s1346_s5 + $0xf8] ss:$12 sps:$4 sm:$0xff]  }
  0x26   :  { %336 = vmatprep.subr.bf16.mxu1 %v929_v25  ;;  %v988_v25 = vld [vmem:[%s1346_s5 + $0x38] ss:$12 sps:$4 sm:$0xff]  }
  0x28   :  { %713 = vmatpush1.bf16.msra.mxu0 %v968_v53  ;;  %v427_v53 = vld [vmem:[%s1349_s6] sm:$0x7] }
  0x29   :  { %337 = vmatpush1.bf16.msra.mxu1 %v931_v26  ;;  %714 = vmatprep.subr.bf16.mxu0 %v973_v54  ;;  %v992_v26 = vld [vmem:[%s1346_s5 + $0x110] ss:$12 sps:$4 sm:$0xff]   ;;  %v439_v54 = vsub.s32 2, %v1253_v5 }
  0x2a   :  { %338 = vmatprep.subr.bf16.mxu1 %v932_v27  ;;  %v993_v27 = vld [vmem:[%s1346_s5 + $0x50] ss:$12 sps:$4 sm:$0xff]  }
  0x2c   :  { %715 = vmatpush1.bf16.msra.mxu0 %v971_v55  ;;  %v432_v55 = vrot.slane %v427_v53, %v1256_v6 }
  0x2d   :  { %339 = vmatpush1.bf16.msra.mxu1 %v934_v28  ;;  %716 = vmatprep.subr.bf16.mxu0 %v976_v56  ;;  %v997_v28 = vld [vmem:[%s1346_s5 + $0x128] ss:$12 sps:$4 sm:$0xff]   ;;  %v436_v56 = vrot.slane %v427_v53, %v1262_v8 }
  0x2e   :  { %340 = vmatprep.subr.bf16.mxu1 %v935_v29  ;;  %v998_v29 = vld [vmem:[%s1346_s5 + $0x68] ss:$12 sps:$4 sm:$0xff]  }
  0x30   :  { %717 = vmatpush1.bf16.msra.mxu0 %v974_v57 }
  0x31   :  { %341 = vmatpush1.bf16.msra.mxu1 %v937_v30  ;;  %718 = vmatprep.subr.bf16.mxu0 %v981_v58  ;;  %v1002_v30 = vld [vmem:[%s1346_s5 + $0x140] ss:$12 sps:$4 sm:$0xff]  }
  0x32   :  { %342 = vmatprep.subr.bf16.mxu1 %v938_v31  ;;  %v1003_v31 = vld [vmem:[%s1346_s5 + $0x80] ss:$12 sps:$4 sm:$0xff]  }
  0x34   :  { %719 = vmatpush1.bf16.msra.mxu0 %v979_v59  ;;  %v440_v59 = vrot.slane %v427_v53, %v439_v54 }
  0x35   :  { %343 = vmatpush1.bf16.msra.mxu1 %v940_v32  ;;  %720 = vmatprep.subr.bf16.mxu0 %v986_v60  ;;  %v1006_v32 = vld [vmem:[%s1346_s5 + $0x154] ss:$12 sps:$4 sm:$0xff]  }
  0x36   :  { %344 = vmatprep.subr.bf16.mxu1 %v941_v33  ;;  %v1007_v33 = vld [vmem:[%s1346_s5 + $0x158] ss:$12 sps:$4 sm:$0xff]  }
  0x38   :  { %721 = vmatpush1.bf16.msra.mxu0 %v984_v61 }
  0x39   :  { %345 = vmatpush1.bf16.msra.mxu1 %v943_v34  ;;  %722 = vmatprep.subr.bf16.mxu0 %v991_v62  ;;  %v1004_v34 = vld [vmem:[%s1346_s5 + $0x150] ss:$12 sps:$4 sm:$0xff]  }
  0x3a   :  { %346 = vmatprep.subr.bf16.mxu1 %v944_v35  ;;  %v1008_v35 = vld [vmem:[%s1346_s5 + $0x98] ss:$12 sps:$4 sm:$0xff]  }
  0x3c   :  { %723 = vmatpush1.bf16.msra.mxu0 %v989_v63 }
  0x3d   :  { %347 = vmatpush1.bf16.msra.mxu1 %v946_v36  ;;  %724 = vmatprep.subr.bf16.mxu0 %v996_v0  ;;  %v1011_v36 = vld [vmem:[%s1346_s5 + $0x16c] ss:$12 sps:$4 sm:$0xff]  }
  0x3e   :  { %348 = vmatprep.subr.bf16.mxu1 %v947_v37  ;;  %v1012_v37 = vld [vmem:[%s1346_s5 + $0x170] ss:$12 sps:$4 sm:$0xff]  }
  0x40   :  { %725 = vmatpush1.bf16.msra.mxu0 %v994_v1 }
  0x41   :  { %349 = vmatpush1.bf16.msra.mxu1 %v949_v38  ;;  %726 = vmatprep.subr.bf16.mxu0 %v1001_v2  ;;  %v1009_v38 = vld [vmem:[%s1346_s5 + $0x168] ss:$12 sps:$4 sm:$0xff]  }
  0x42   :  { %873 = vmatprep.subr.bf16.mxu1 %v977_v47 }
  0x44   :  { %727 = vmatpush1.bf16.msra.mxu0 %v999_v3 }
  0x45   :  { %728 = vmatprep.subr.bf16.mxu0 %v1006_v32 }
  0x48   :  { %729 = vmatpush1.bf16.msra.mxu0 %v1004_v34 }
  0x49   :  { %730 = vmatprep.subr.bf16.mxu0 %v1011_v36 }
  0x4c   :  { %731 = vmatpush1.bf16.msra.mxu0 %v1009_v38 }
  0xdd   :  { %v103_v11 = vpop.f32.mrb[0].mxu0 }
  0xde   :  { %v104_v12 = vadd.f32 %v103_v11, %v38_v9  ;;  %v105_v13 = vpop.f32.mrb[1].mxu0 }
  0xdf   :  { %v106_v14 = vadd.f32 %v105_v13, %v42_v10  ;;  %v107_v15 = vpop.f32.mrb[2].mxu0 }
  0xe0   :  { %v110_v16 = vmax.f32 %v104_v12, 0.0  ;;  %v108_v17 = vpop.f32.mrb[3].mxu0 }
  0xe1   :  { %v111_v18 = vmax.f32 %v106_v14, 0.0 }
  0xe2   :  { %v112_v21 = vpack.c.bf16 %v110_v16, %v110_v16 }
  0xe3   :  { %v113_v19 = vpack.c.bf16 %v111_v18, %v111_v18 }
  0xe5   :  { %350 = vmatprep.mubr.bf16.mxu1 %v113_v19 }
  0xe6   :  { %351 = vmatmul.mubr.bf16.vlgmr.msra.gmra.mrb[0].mxu1 %v112_v21 }
  0xe7   :  { %874 = vmatpush3.bf16.msra.mxu1 %v978_v20 }
  0xe8   :  { %875 = vmatprep.subr.bf16.mxu1 %v982_v22 }
  0xeb   :  { %876 = vmatpush3.bf16.msra.mxu1 %v983_v23 }
  0xec   :  { %877 = vmatprep.subr.bf16.mxu1 %v987_v24 }
  0xef   :  { %878 = vmatpush3.bf16.msra.mxu1 %v988_v25 }
  0xf0   :  { %879 = vmatprep.subr.bf16.mxu1 %v992_v26 }
  0xf3   :  { %880 = vmatpush3.bf16.msra.mxu1 %v993_v27 }
  0xf4   :  { %881 = vmatprep.subr.bf16.mxu1 %v997_v28 }
  0xf7   :  { %882 = vmatpush3.bf16.msra.mxu1 %v998_v29 }
  0xf8   :  { %883 = vmatprep.subr.bf16.mxu1 %v1002_v30 }
  0xfb   :  { %884 = vmatpush3.bf16.msra.mxu1 %v1003_v31 }
  0xfc   :  { %885 = vmatprep.subr.bf16.mxu1 %v1007_v33 }
  0xff   :  { %886 = vmatpush3.bf16.msra.mxu1 %v1008_v35 }
 0x100   :  { %887 = vmatprep.subr.bf16.mxu1 %v1012_v37 }
 0x103   :  { %888 = vmatpush3.bf16.msra.mxu1 %v1013_v39 }
 0x1b9   :  { %v352_v43 = vpop.f32.mrb[0].mxu1 }
 0x1ba   :  { %v353_v44 = vadd.f32 %v352_v43, %v151_v41  ;;  %v354_v45 = vpop.f32.mrb[1].mxu1 }
 0x1bb   :  { %v355_v46 = vadd.f32 %v354_v45, %v155_v42  ;;  %v356_v47 = vpop.f32.mrb[2].mxu1 }
 0x1bc   :  { %v359_v48 = vmax.f32 %v353_v44, 0.0  ;;  %v357_v49 = vpop.f32.mrb[3].mxu1 }
 0x1bd   :  { %v360_v50 = vmax.f32 %v355_v46, 0.0 }
 0x1be   :  { %v361_v52 = vpack.c.bf16 %v359_v48, %v359_v48 }
 0x1bf   :  { %v362_v51 = vpack.c.bf16 %v360_v50, %v360_v50 }
 0x1c1   :  { %732 = vmatprep.mubr.bf16.mxu0 %v362_v51  ;;  %773 = vmatprep.mubr.bf16.mxu1 %v362_v51 }
 0x1c2   :  { %733 = vmatmul.mubr.bf16.vlgmr.msra.gmra.mrb[4].mxu0 %v361_v52  ;;  %774 = vmatmul.mubr.bf16.vlgmr.msra.gmra.mrb[4].mxu1 %v361_v52 }
 0x295   :  { %v734_v57 = vpop.f32.mrb[4].mxu0  ;;  %v889_v58 = vpop.f32.mrb[4].mxu1 }
 0x296   :  { %v735_v60 = vadd.f32 %v734_v57, %v432_v55  ;;  %v736_v61 = vpop.f32.mrb[5].mxu0  ;;  %v890_v62 = vpop.f32.mrb[5].mxu1 }
 0x297   :  { %v737_v63 = vadd.f32 %v736_v61, %v436_v56  ;;  %v891_v0 = vadd.f32 %v890_v62, %v889_v58  ;;  %v738_v1 = vpop.f32.mrb[6].mxu0  ;;  %v892_v2 = vpop.f32.mrb[6].mxu1 }
 0x298   :  { %781 = vst [vmem:[%s1350_s7] sm:$0xff] %v735_v60  ;;  %v739_v3 = vpop.f32.mrb[7].mxu0  ;;  %v893_v4 = vpop.f32.mrb[7].mxu1 }
 0x299   :  { %782 = vst [vmem:[%s1350_s7 + $0x8] sm:$0xff] %v737_v63  ;;  %v776_v5 = vadd.f32 %v891_v0, %v440_v59 }
 0x29b   :  { %783 = vst [vmem:[%s1350_s7 + $0x10] sm:$0xff] %v776_v5 }

</bundles_post_ra>
